<compile_context>
chip_gen: v7x
topology: tpu7x:2x2x1
jax: 0.10.0
libtpu: 0.0.40
codegen_flags: <defaults>
</compile_context>

<pallas_src>
import jax
import jax.numpy as jnp
from jax.experimental import pallas as pl
from jax.experimental.pallas import tpu as pltpu


def _round_up(x: int, m: int) -> int:
    return ((x + m - 1) // m) * m


# -----------------------------------------------------------------------------
# Fused-gather kernel (tables resident in VMEM, transposed/feature-major math).
# -----------------------------------------------------------------------------
def _make_fused_kernel(num_users: int, num_items: int, tile_b: int):
    def kernel(
        uidx_ref, iidx_ref,            # (1, TB) int32
        ut_ref, it_ref,                # (W, U) / (W, I) resident tables (transposed)
        w1ut_ref, w1it_ref, b1t_ref,   # (l1, W), (l1, W), (l1, 1)
        w2t_ref, b2t_ref,              # (l2, l1), (l2, 1)
        w3t_ref, b3t_ref,              # (l3, l2), (l3, 1)
        wfg_ref, wfm_ref, bf_ref,      # (1, W), (1, l3), (1, 1)
        out_ref,                       # (1, TB)
    ):
        f32 = jnp.float32
        # One-hot gather on the MXU (exact in f32). onehot[u, r] = (u == idx[r]).
        u_oh = jnp.where(
            jax.lax.broadcasted_iota(jnp.int32, (num_users, tile_b), 0) == uidx_ref[...],
            1.0, 0.0).astype(f32)
        i_oh = jnp.where(
            jax.lax.broadcasted_iota(jnp.int32, (num_items, tile_b), 0) == iidx_ref[...],
            1.0, 0.0).astype(f32)
        u_full = jnp.dot(ut_ref[...], u_oh, preferred_element_type=f32)   # (W, TB)
        i_full = jnp.dot(it_ref[...], i_oh, preferred_element_type=f32)   # (W, TB)

        # MLP branch (feature-major). W1u/W1i are zero-padded over the gmf rows
        # so full-width inputs can be used without slicing (exact).
        h = (jnp.dot(w1ut_ref[...], u_full, preferred_element_type=f32)
             + jnp.dot(w1it_ref[...], i_full, preferred_element_type=f32)
             + b1t_ref[...])
        h = jnp.maximum(h, 0.0)                                            # (l1, TB)
        h = jnp.maximum(
            jnp.dot(w2t_ref[...], h, preferred_element_type=f32) + b2t_ref[...], 0.0)
        h = jnp.maximum(
            jnp.dot(w3t_ref[...], h, preferred_element_type=f32) + b3t_ref[...], 0.0)

        # Final Linear(mf_dim + l3 -> 1): the GMF part is folded into a
        # zero-padded row weight over the full 40-wide product (exact), and the
        # contraction is done with tiny MXU matmuls -> result is (1, TB),
        # i.e. the output store is lane-dense.
        score = (jnp.dot(wfg_ref[...], u_full * i_full, preferred_element_type=f32)
                 + jnp.dot(wfm_ref[...], h, preferred_element_type=f32)
                 + bf_ref[...])                                            # (1, TB)
        out_ref[...] = jax.nn.sigmoid(score)

    return kernel


# -----------------------------------------------------------------------------
# Streamed fallback kernel (row-major, activations gathered in the wrapper).
# -----------------------------------------------------------------------------
def _streamed_kernel(
    u_ref, i_ref,                      # (TB, W) gathered activation streams
    w1u_ref, w1i_ref, b1_ref,          # (W, l1), (W, l1), (1, l1)
    w2_ref, b2_ref, w3_ref, b3_ref,
    wfg_ref, wfm_ref, bf_ref,          # (1, W), (1, l3), (1, 1)
    out_ref,                           # (TB, 1)  (masked store: tiny, accepted)
):
    f32 = jnp.float32
    u = u_ref[...]
    it = i_ref[...]
    h = (jnp.dot(u, w1u_ref[...], preferred_element_type=f32)
         + jnp.dot(it, w1i_ref[...], preferred_element_type=f32)
         + b1_ref[...])
    h = jnp.maximum(h, 0.0)
    h = jnp.maximum(jnp.dot(h, w2_ref[...], preferred_element_type=f32) + b2_ref[...], 0.0)
    h = jnp.maximum(jnp.dot(h, w3_ref[...], preferred_element_type=f32) + b3_ref[...], 0.0)
    score = (jnp.sum(u * it * wfg_ref[...], axis=-1, keepdims=True)
             + jnp.sum(h * wfm_ref[...], axis=-1, keepdims=True)
             + bf_ref[...])
    out_ref[...] = jax.nn.sigmoid(score)


def _resident_spec(a):
    # Whole array as one block, constant index_map -> stays VMEM-resident.
    return pl.BlockSpec(a.shape, lambda i: (0, 0))


def neumf_forward(user_idx, item_idx, params, *, tile_b: int = 2048, fuse_gather=None):
    """NeuMF forward. Primary path fuses the embedding gathers into the kernel."""
    B = int(user_idx.shape[0])
    user_tab = params["user_emb"]            # (U, mf_dim + half)  gmf || mlp
    item_tab = params["item_emb"]            # (I, mf_dim + half)
    U, width = user_tab.shape
    I = item_tab.shape[0]
    w1, b1 = params["w1"], params["b1"]      # (64, 32), (1, 32)
    w2, b2 = params["w2"], params["b2"]      # (32, 16), (1, 16)
    w3, b3 = params["w3"], params["b3"]      # (16, 8),  (1, 8)
    wf, bf = params["wf"], params["bf"]      # (mf+8, 1), (1, 1)
    half = w1.shape[0] // 2
    mf_dim = width - half
    l1, l2, l3 = w1.shape[1], w2.shape[1], w3.shape[1]

    if fuse_gather is None:
        # Fuse when both tables (and the (rows, TILE_B) one-hots) comfortably
        # fit in VMEM.  TODO(synk): for larger tables, gather via per-row
        # make_async_copy DMAs double-buffered against compute instead of the
        # JAX-side jnp.take fallback below.
        fuse_gather = max(U, I) <= 1024

    # Zero-padded first-layer / final weights (exact; avoids in-kernel slicing).
    zeros_mf = jnp.zeros((mf_dim, l1), jnp.float32)
    w1u_pad = jnp.concatenate([zeros_mf, w1[:half, :]], axis=0)     # (W, l1)
    w1i_pad = jnp.concatenate([zeros_mf, w1[half:, :]], axis=0)     # (W, l1)
    wfg_row = jnp.concatenate(
        [wf[:mf_dim, :], jnp.zeros((half, 1), jnp.float32)], axis=0).T   # (1, W)
    wfm_row = wf[mf_dim:, :].T                                      # (1, l3)

    # Batch tiling (pad with index 0, a valid row; padded rows are sliced off).
    tile_b = _round_up(max(8, min(int(tile_b), _round_up(B, 8))), 8)
    if fuse_gather:
        # Cap tile so the (U,TB)+(I,TB) f32 one-hot intermediates stay ~<6 MiB.
        max_tb = max(8, ((6 * 1024 * 1024) // (4 * (U + I))) // 8 * 8)
        tile_b = min(tile_b, max_tb)
    b_pad = _round_up(B, tile_b)
    num_tiles = b_pad // tile_b
    pad = b_pad - B
    uidx = jnp.pad(user_idx.astype(jnp.int32), (0, pad))
    iidx = jnp.pad(item_idx.astype(jnp.int32), (0, pad))

    compiler_params = pltpu.CompilerParams(
        dimension_semantics=("parallel",),        # megacore / 2-TC sharding
        vmem_limit_bytes=32 * 1024 * 1024,        # raise v5e's 16 MiB default
    )

    if fuse_gather:
        # ------------------ fused-gather, feature-major path ------------------
        uidx2 = uidx.reshape(num_tiles, tile_b)
        iidx2 = iidx.reshape(num_tiles, tile_b)
        inputs = (
            uidx2, iidx2,
            user_tab.T, item_tab.T,               # (W, U), (W, I) resident
            w1u_pad.T, w1i_pad.T, b1.T,           # (l1, W) x2, (l1, 1)
            w2.T, b2.T, w3.T, b3.T,               # (l2, l1), (l2, 1), (l3, l2), (l3, 1)
            wfg_row, wfm_row, bf,                 # (1, W), (1, l3), (1, 1)
        )
        idx_spec = pl.BlockSpec((1, tile_b), lambda i: (i, 0))
        in_specs = [idx_spec, idx_spec] + [_resident_spec(a) for a in inputs[2:]]
        out = pl.pallas_call(
            _make_fused_kernel(U, I, tile_b),
            out_shape=jax.ShapeDtypeStruct((num_tiles, tile_b), jnp.float32),
            grid_spec=pltpu.PrefetchScalarGridSpec(
                num_scalar_prefetch=0,
                grid=(num_tiles,),
                in_specs=in_specs,
                out_specs=pl.BlockSpec((1, tile_b), lambda i: (i, 0)),  # lane-dense
            ),
            compiler_params=compiler_params,
        )(*inputs)
        return out.reshape(b_pad)[:B].reshape(B, 1)

    # ------------------ streamed fallback (large tables) ------------------
    u_rows = jnp.take(user_tab, uidx, axis=0)     # (Bp, W) single 40-wide stream
    i_rows = jnp.take(item_tab, iidx, axis=0)     # (Bp, W)
    inputs = (u_rows, i_rows, w1u_pad, w1i_pad, b1, w2, b2, w3, b3,
              wfg_row, wfm_row, bf)
    act_spec = pl.BlockSpec((tile_b, width), lambda i: (i, 0))
    in_specs = [act_spec, act_spec] + [_resident_spec(a) for a in inputs[2:]]
    out = pl.pallas_call(
        _streamed_kernel,
        out_shape=jax.ShapeDtypeStruct((b_pad, 1), jnp.float32),
        grid_spec=pltpu.PrefetchScalarGridSpec(
            num_scalar_prefetch=0,
            grid=(num_tiles,),
            in_specs=in_specs,
            out_specs=pl.BlockSpec((tile_b, 1), lambda i: (i, 0)),
        ),
        compiler_params=compiler_params,
    )(*inputs)
    return out[:B]


# -----------------------------------------------------------------------------
# Parameter init (matches the PyTorch module's shapes / init scheme) + reference
# -----------------------------------------------------------------------------
def xavier_uniform(key, fan_in, fan_out):
    bound = jnp.sqrt(6.0 / (fan_in + fan_out))
    # Stored (in, out) so forward computes y = x @ W + b.
    return jax.random.uniform(key, (fan_in, fan_out), minval=-bound, maxval=bound,
                              dtype=jnp.float32)


def init_params(key, num_users, num_items, mf_dim=8, layers=(64, 32, 16, 8)):
    half = layers[0] // 2
    ks = jax.random.split(key, 6)
    return {
        # gmf || mlp embeddings pre-concatenated into one table per side.
        "user_emb": 0.01 * jax.random.normal(ks[0], (num_users, mf_dim + half), jnp.float32),
        "item_emb": 0.01 * jax.random.normal(ks[1], (num_items, mf_dim + half), jnp.float32),
        # MLP: Linear(64->32), Linear(32->16), Linear(16->8)
        "w1": xavier_uniform(ks[2], layers[0], layers[1]),
        "b1": jnp.zeros((1, layers[1]), jnp.float32),
        "w2": xavier_uniform(ks[3], layers[1], layers[2]),
        "b2": jnp.zeros((1, layers[2]), jnp.float32),
        "w3": xavier_uniform(ks[4], layers[2], layers[3]),
        "b3": jnp.zeros((1, layers[3]), jnp.float32),
        # Final Linear(mf_dim + layers[-1] -> 1)
        "wf": xavier_uniform(ks[5], mf_dim + layers[-1], 1),
        "bf": jnp.zeros((1, 1), jnp.float32),
    }


def reference_forward(user_idx, item_idx, params):
    """Pure-JAX reference mirroring the PyTorch forward (eval mode)."""
    mf_dim = params["wf"].shape[0] - params["w3"].shape[1]
    u = jnp.take(params["user_emb"], user_idx, axis=0)
    it = jnp.take(params["item_emb"], item_idx, axis=0)
    gmf = u[:, :mf_dim] * it[:, :mf_dim]
    h = jnp.concatenate([u[:, mf_dim:], it[:, mf_dim:]], axis=-1)
    h = jnp.maximum(h @ params["w1"] + params["b1"], 0.0)
    h = jnp.maximum(h @ params["w2"] + params["b2"], 0.0)
    h = jnp.maximum(h @ params["w3"] + params["b3"], 0.0)
    score = jnp.concatenate([gmf, h], axis=-1) @ params["wf"] + params["bf"]
    return jax.nn.sigmoid(score)


if __name__ == "__main__":
    num_users, num_items = 32, 48
    key = jax.random.PRNGKey(0)
    k_params, k_user, k_item = jax.random.split(key, 3)
    params = init_params(k_params, num_users, num_items)

    # Small test (single grid step, fused-gather path).
    batch = 8
    u_idx = jax.random.randint(k_user, (batch,), 0, num_users, dtype=jnp.int32)
    i_idx = jax.random.randint(k_item, (batch,), 0, num_items, dtype=jnp.int32)
    out = jax.block_until_ready(neumf_forward(u_idx, i_idx, params))
    ref = reference_forward(u_idx, i_idx, params)
    assert out.shape == (batch, 1)
    assert jnp.allclose(out, ref, atol=1e-5, rtol=1e-5), "mismatch (fused, small)"

    # Multi-tile fused test: exercises the grid, resident tables, remainder pad.
    batch2 = 300
    u2 = jax.random.randint(jax.random.PRNGKey(1), (batch2,), 0, num_users, dtype=jnp.int32)
    i2 = jax.random.randint(jax.random.PRNGKey(2), (batch2,), 0, num_items, dtype=jnp.int32)
    out2 = jax.block_until_ready(neumf_forward(u2, i2, params, tile_b=128))
    ref2 = reference_forward(u2, i2, params)
    assert out2.shape == (batch2, 1)
    assert jnp.allclose(out2, ref2, atol=1e-5, rtol=1e-5), "mismatch (fused, tiled)"

    # Streamed fallback test (large-table path forced on small tables).
    batch3 = 100
    u3 = jax.random.randint(jax.random.PRNGKey(3), (batch3,), 0, num_users, dtype=jnp.int32)
    i3 = jax.random.randint(jax.random.PRNGKey(4), (batch3,), 0, num_items, dtype=jnp.int32)
    out3 = jax.block_until_ready(
        neumf_forward(u3, i3, params, tile_b=32, fuse_gather=False))
    ref3 = reference_forward(u3, i3, params)
    assert out3.shape == (batch3, 1)
    assert jnp.allclose(out3, ref3, atol=1e-5, rtol=1e-5), "mismatch (streamed)"

    print("KERNEL_OK")
</pallas_src>

<mosaic_0001>
module attributes {stable_mosaic.version = 11 : i64} {
  func.func @kernel(%arg0: i32, %arg1: memref<1x8xi32, #tpu.memory_space<vmem>>, %arg2: memref<1x8xi32, #tpu.memory_space<vmem>>, %arg3: memref<40x32xf32, #tpu.memory_space<vmem>>, %arg4: memref<40x48xf32, #tpu.memory_space<vmem>>, %arg5: memref<32x40xf32, #tpu.memory_space<vmem>>, %arg6: memref<32x40xf32, #tpu.memory_space<vmem>>, %arg7: memref<32x1xf32, #tpu.memory_space<vmem>>, %arg8: memref<16x32xf32, #tpu.memory_space<vmem>>, %arg9: memref<16x1xf32, #tpu.memory_space<vmem>>, %arg10: memref<8x16xf32, #tpu.memory_space<vmem>>, %arg11: memref<8x1xf32, #tpu.memory_space<vmem>>, %arg12: memref<1x40xf32, #tpu.memory_space<vmem>>, %arg13: memref<1x8xf32, #tpu.memory_space<vmem>>, %arg14: memref<1x1xf32, #tpu.memory_space<vmem>>, %arg15: memref<1x8xf32, #tpu.memory_space<vmem>>) attributes {dimension_semantics = [#tpu.dimension_semantics<parallel>], iteration_bounds = array<i64: 1>, scalar_prefetch = 0 : i64, scratch_operands = 0 : i64, tpu.core_type = #tpu.core_type<tc>, window_params = [{transform_indices = @transform_0, window_bounds = array<i64: 1, 8>}, {transform_indices = @transform_1, window_bounds = array<i64: 1, 8>}, {pipeline_mode = #tpu.pipeline_mode<synchronous>, transform_indices = @transform_2, window_bounds = array<i64: 40, 32>}, {pipeline_mode = #tpu.pipeline_mode<synchronous>, transform_indices = @transform_3, window_bounds = array<i64: 40, 48>}, {pipeline_mode = #tpu.pipeline_mode<synchronous>, transform_indices = @transform_4, window_bounds = array<i64: 32, 40>}, {pipeline_mode = #tpu.pipeline_mode<synchronous>, transform_indices = @transform_5, window_bounds = array<i64: 32, 40>}, {pipeline_mode = #tpu.pipeline_mode<synchronous>, transform_indices = @transform_6, window_bounds = array<i64: 32, 1>}, {pipeline_mode = #tpu.pipeline_mode<synchronous>, transform_indices = @transform_7, window_bounds = array<i64: 16, 32>}, {pipeline_mode = #tpu.pipeline_mode<synchronous>, transform_indices = @transform_8, window_bounds = array<i64: 16, 1>}, {pipeline_mode = #tpu.pipeline_mode<synchronous>, transform_indices = @transform_9, window_bounds = array<i64: 8, 16>}, {pipeline_mode = #tpu.pipeline_mode<synchronous>, transform_indices = @transform_10, window_bounds = array<i64: 8, 1>}, {pipeline_mode = #tpu.pipeline_mode<synchronous>, transform_indices = @transform_11, window_bounds = array<i64: 1, 40>}, {pipeline_mode = #tpu.pipeline_mode<synchronous>, transform_indices = @transform_12, window_bounds = array<i64: 1, 8>}, {pipeline_mode = #tpu.pipeline_mode<synchronous>, transform_indices = @transform_13, window_bounds = array<i64: 1, 1>}, {transform_indices = @transform_14, window_bounds = array<i64: 1, 8>}]} {
    %0 = tpu.iota {dimensions = array<i32: 0>} : vector<32x8xi32>
    %c0 = arith.constant 0 : index
    %c0_0 = arith.constant 0 : index
    %1 = vector.load %arg1[%c0, %c0_0] : memref<1x8xi32, #tpu.memory_space<vmem>>, vector<1x8xi32>
    %2 = vector.broadcast %1 : vector<1x8xi32> to vector<32x8xi32>
    %3 = arith.cmpi eq, %0, %2 : vector<32x8xi32>
    %cst = arith.constant 1.000000e+00 : f32
    %cst_1 = arith.constant 0.000000e+00 : f32
    %4 = vector.broadcast %cst : f32 to vector<32x8xf32>
    %5 = vector.broadcast %cst_1 : f32 to vector<32x8xf32>
    %6 = arith.select %3, %4, %5 : vector<32x8xi1>, vector<32x8xf32>
    %7 = tpu.iota {dimensions = array<i32: 0>} : vector<48x8xi32>
    %c0_2 = arith.constant 0 : index
    %c0_3 = arith.constant 0 : index
    %8 = vector.load %arg2[%c0_2, %c0_3] : memref<1x8xi32, #tpu.memory_space<vmem>>, vector<1x8xi32>
    %9 = vector.broadcast %8 : vector<1x8xi32> to vector<48x8xi32>
    %10 = arith.cmpi eq, %7, %9 : vector<48x8xi32>
    %cst_4 = arith.constant 1.000000e+00 : f32
    %cst_5 = arith.constant 0.000000e+00 : f32
    %11 = vector.broadcast %cst_4 : f32 to vector<48x8xf32>
    %12 = vector.broadcast %cst_5 : f32 to vector<48x8xf32>
    %13 = arith.select %10, %11, %12 : vector<48x8xi1>, vector<48x8xf32>
    %c0_6 = arith.constant 0 : index
    %c0_7 = arith.constant 0 : index
    %14 = vector.load %arg3[%c0_6, %c0_7] : memref<40x32xf32, #tpu.memory_space<vmem>>, vector<40x32xf32>
    %cst_8 = arith.constant dense<0.000000e+00> : vector<40x8xf32>
    %15 = tpu.matmul %14, %6, %cst_8 {dimension_numbers = #tpu.dot_dimension_numbers<[1], [0], [0], [1], [0, 0, 1, 1], [], []>} : vector<40x32xf32>, vector<32x8xf32>, vector<40x8xf32> -> vector<40x8xf32>
    %c0_9 = arith.constant 0 : index
    %c0_10 = arith.constant 0 : index
    %16 = vector.load %arg4[%c0_9, %c0_10] : memref<40x48xf32, #tpu.memory_space<vmem>>, vector<40x48xf32>
    %cst_11 = arith.constant dense<0.000000e+00> : vector<40x8xf32>
    %17 = tpu.matmul %16, %13, %cst_11 {dimension_numbers = #tpu.dot_dimension_numbers<[1], [0], [0], [1], [0, 0, 1, 1], [], []>} : vector<40x48xf32>, vector<48x8xf32>, vector<40x8xf32> -> vector<40x8xf32>
    %c0_12 = arith.constant 0 : index
    %c0_13 = arith.constant 0 : index
    %18 = vector.load %arg5[%c0_12, %c0_13] : memref<32x40xf32, #tpu.memory_space<vmem>>, vector<32x40xf32>
    %cst_14 = arith.constant dense<0.000000e+00> : vector<32x8xf32>
    %19 = tpu.matmul %18, %15, %cst_14 {dimension_numbers = #tpu.dot_dimension_numbers<[1], [0], [0], [1], [0, 0, 1, 1], [], []>} : vector<32x40xf32>, vector<40x8xf32>, vector<32x8xf32> -> vector<32x8xf32>
    %c0_15 = arith.constant 0 : index
    %c0_16 = arith.constant 0 : index
    %20 = vector.load %arg6[%c0_15, %c0_16] : memref<32x40xf32, #tpu.memory_space<vmem>>, vector<32x40xf32>
    %cst_17 = arith.constant dense<0.000000e+00> : vector<32x8xf32>
    %21 = tpu.matmul %20, %17, %cst_17 {dimension_numbers = #tpu.dot_dimension_numbers<[1], [0], [0], [1], [0, 0, 1, 1], [], []>} : vector<32x40xf32>, vector<40x8xf32>, vector<32x8xf32> -> vector<32x8xf32>
    %22 = arith.addf %19, %21 : vector<32x8xf32>
    %c0_18 = arith.constant 0 : index
    %c0_19 = arith.constant 0 : index
    %23 = vector.load %arg7[%c0_18, %c0_19] : memref<32x1xf32, #tpu.memory_space<vmem>>, vector<32x1xf32>
    %24 = vector.broadcast %23 : vector<32x1xf32> to vector<32x8xf32>
    %25 = arith.addf %22, %24 : vector<32x8xf32>
    %cst_20 = arith.constant 0.000000e+00 : f32
    %26 = vector.broadcast %cst_20 : f32 to vector<32x8xf32>
    %27 = arith.maximumf %25, %26 : vector<32x8xf32>
    %c0_21 = arith.constant 0 : index
    %c0_22 = arith.constant 0 : index
    %28 = vector.load %arg8[%c0_21, %c0_22] : memref<16x32xf32, #tpu.memory_space<vmem>>, vector<16x32xf32>
    %cst_23 = arith.constant dense<0.000000e+00> : vector<16x8xf32>
    %29 = tpu.matmul %28, %27, %cst_23 {dimension_numbers = #tpu.dot_dimension_numbers<[1], [0], [0], [1], [0, 0, 1, 1], [], []>} : vector<16x32xf32>, vector<32x8xf32>, vector<16x8xf32> -> vector<16x8xf32>
    %c0_24 = arith.constant 0 : index
    %c0_25 = arith.constant 0 : index
    %30 = vector.load %arg9[%c0_24, %c0_25] : memref<16x1xf32, #tpu.memory_space<vmem>>, vector<16x1xf32>
    %31 = vector.broadcast %30 : vector<16x1xf32> to vector<16x8xf32>
    %32 = arith.addf %29, %31 : vector<16x8xf32>
    %cst_26 = arith.constant 0.000000e+00 : f32
    %33 = vector.broadcast %cst_26 : f32 to vector<16x8xf32>
    %34 = arith.maximumf %32, %33 : vector<16x8xf32>
    %c0_27 = arith.constant 0 : index
    %c0_28 = arith.constant 0 : index
    %35 = vector.load %arg10[%c0_27, %c0_28] : memref<8x16xf32, #tpu.memory_space<vmem>>, vector<8x16xf32>
    %cst_29 = arith.constant dense<0.000000e+00> : vector<8x8xf32>
    %36 = tpu.matmul %35, %34, %cst_29 {dimension_numbers = #tpu.dot_dimension_numbers<[1], [0], [0], [1], [0, 0, 1, 1], [], []>} : vector<8x16xf32>, vector<16x8xf32>, vector<8x8xf32> -> vector<8x8xf32>
    %c0_30 = arith.constant 0 : index
    %c0_31 = arith.constant 0 : index
    %37 = vector.load %arg11[%c0_30, %c0_31] : memref<8x1xf32, #tpu.memory_space<vmem>>, vector<8x1xf32>
    %38 = vector.broadcast %37 : vector<8x1xf32> to vector<8x8xf32>
    %39 = arith.addf %36, %38 : vector<8x8xf32>
    %cst_32 = arith.constant 0.000000e+00 : f32
    %40 = vector.broadcast %cst_32 : f32 to vector<8x8xf32>
    %41 = arith.maximumf %39, %40 : vector<8x8xf32>
    %c0_33 = arith.constant 0 : index
    %c0_34 = arith.constant 0 : index
    %42 = vector.load %arg12[%c0_33, %c0_34] : memref<1x40xf32, #tpu.memory_space<vmem>>, vector<1x40xf32>
    %43 = arith.mulf %15, %17 : vector<40x8xf32>
    %cst_35 = arith.constant dense<0.000000e+00> : vector<1x8xf32>
    %44 = tpu.matmul %42, %43, %cst_35 {dimension_numbers = #tpu.dot_dimension_numbers<[1], [0], [0], [1], [0, 0, 1, 1], [], []>} : vector<1x40xf32>, vector<40x8xf32>, vector<1x8xf32> -> vector<1x8xf32>
    %c0_36 = arith.constant 0 : index
    %c0_37 = arith.constant 0 : index
    %45 = vector.load %arg13[%c0_36, %c0_37] : memref<1x8xf32, #tpu.memory_space<vmem>>, vector<1x8xf32>
    %cst_38 = arith.constant dense<0.000000e+00> : vector<1x8xf32>
    %46 = tpu.matmul %45, %41, %cst_38 {dimension_numbers = #tpu.dot_dimension_numbers<[1], [0], [0], [1], [0, 0, 1, 1], [], []>} : vector<1x8xf32>, vector<8x8xf32>, vector<1x8xf32> -> vector<1x8xf32>
    %47 = arith.addf %44, %46 : vector<1x8xf32>
    %c0_39 = arith.constant 0 : index
    %c0_40 = arith.constant 0 : index
    %48 = vector.load %arg14[%c0_39, %c0_40] : memref<1x1xf32, #tpu.memory_space<vmem>>, vector<1x1xf32>
    %49 = vector.broadcast %48 : vector<1x1xf32> to vector<1x8xf32>
    %50 = arith.addf %47, %49 : vector<1x8xf32>
    %51 = arith.negf %50 : vector<1x8xf32>
    %52 = math.exp %51 : vector<1x8xf32>
    %cst_41 = arith.constant 1.000000e+00 : f32
    %53 = vector.broadcast %cst_41 : f32 to vector<1x8xf32>
    %54 = arith.addf %53, %52 : vector<1x8xf32>
    %55 = arith.divf %53, %54 : vector<1x8xf32>
    %c0_42 = arith.constant 0 : index
    %c0_43 = arith.constant 0 : index
    %56 = vector.load %arg15[%c0_42, %c0_43] : memref<1x8xf32, #tpu.memory_space<vmem>>, vector<1x8xf32>
    tpu.vector_store %arg15[%c0_42, %c0_43], %55 {strides = array<i32>} : memref<1x8xf32, #tpu.memory_space<vmem>>, vector<1x8xf32>,
    return
  }
  func.func @transform_0(%arg0: i32) -> (i32, i32) {
    %c0_i32 = arith.constant 0 : i32
    %c0_i32_0 = arith.constant 0 : i32
    return %arg0, %c0_i32 : i32, i32
  }
  func.func @transform_1(%arg0: i32) -> (i32, i32) {
    %c0_i32 = arith.constant 0 : i32
    %c0_i32_0 = arith.constant 0 : i32
    return %arg0, %c0_i32 : i32, i32
  }
  func.func @transform_2(%arg0: i32) -> (i32, i32) {
    %c0_i32 = arith.constant 0 : i32
    %c0_i32_0 = arith.constant 0 : i32
    %c0_i32_1 = arith.constant 0 : i32
    return %c0_i32, %c0_i32_0 : i32, i32
  }
  func.func @transform_3(%arg0: i32) -> (i32, i32) {
    %c0_i32 = arith.constant 0 : i32
    %c0_i32_0 = arith.constant 0 : i32
    %c0_i32_1 = arith.constant 0 : i32
    return %c0_i32, %c0_i32_0 : i32, i32
  }
  func.func @transform_4(%arg0: i32) -> (i32, i32) {
    %c0_i32 = arith.constant 0 : i32
    %c0_i32_0 = arith.constant 0 : i32
    %c0_i32_1 = arith.constant 0 : i32
    return %c0_i32, %c0_i32_0 : i32, i32
  }
  func.func @transform_5(%arg0: i32) -> (i32, i32) {
    %c0_i32 = arith.constant 0 : i32
    %c0_i32_0 = arith.constant 0 : i32
    %c0_i32_1 = arith.constant 0 : i32
    return %c0_i32, %c0_i32_0 : i32, i32
  }
  func.func @transform_6(%arg0: i32) -> (i32, i32) {
    %c0_i32 = arith.constant 0 : i32
    %c0_i32_0 = arith.constant 0 : i32
    %c0_i32_1 = arith.constant 0 : i32
    return %c0_i32, %c0_i32_0 : i32, i32
  }
  func.func @transform_7(%arg0: i32) -> (i32, i32) {
    %c0_i32 = arith.constant 0 : i32
    %c0_i32_0 = arith.constant 0 : i32
    %c0_i32_1 = arith.constant 0 : i32
    return %c0_i32, %c0_i32_0 : i32, i32
  }
  func.func @transform_8(%arg0: i32) -> (i32, i32) {
    %c0_i32 = arith.constant 0 : i32
    %c0_i32_0 = arith.constant 0 : i32
    %c0_i32_1 = arith.constant 0 : i32
    return %c0_i32, %c0_i32_0 : i32, i32
  }
  func.func @transform_9(%arg0: i32) -> (i32, i32) {
    %c0_i32 = arith.constant 0 : i32
    %c0_i32_0 = arith.constant 0 : i32
    %c0_i32_1 = arith.constant 0 : i32
    return %c0_i32, %c0_i32_0 : i32, i32
  }
  func.func @transform_10(%arg0: i32) -> (i32, i32) {
    %c0_i32 = arith.constant 0 : i32
    %c0_i32_0 = arith.constant 0 : i32
    %c0_i32_1 = arith.constant 0 : i32
    return %c0_i32, %c0_i32_0 : i32, i32
  }
  func.func @transform_11(%arg0: i32) -> (i32, i32) {
    %c0_i32 = arith.constant 0 : i32
    %c0_i32_0 = arith.constant 0 : i32
    %c0_i32_1 = arith.constant 0 : i32
    return %c0_i32, %c0_i32_0 : i32, i32
  }
  func.func @transform_12(%arg0: i32) -> (i32, i32) {
    %c0_i32 = arith.constant 0 : i32
    %c0_i32_0 = arith.constant 0 : i32
    %c0_i32_1 = arith.constant 0 : i32
    return %c0_i32, %c0_i32_0 : i32, i32
  }
  func.func @transform_13(%arg0: i32) -> (i32, i32) {
    %c0_i32 = arith.constant 0 : i32
    %c0_i32_0 = arith.constant 0 : i32
    %c0_i32_1 = arith.constant 0 : i32
    return %c0_i32, %c0_i32_0 : i32, i32
  }
  func.func @transform_14(%arg0: i32) -> (i32, i32) {
    %c0_i32 = arith.constant 0 : i32
    %c0_i32_0 = arith.constant 0 : i32
    return %arg0, %c0_i32 : i32, i32
  }
}

</mosaic_0001>

<bundles_post_ra>
// kernel: tpu_custom_call.1
= control target key start
LH: loop header
LB: loop body
LE: loop exit
PB: predicated region body
PF: predicated region fallthrough
CT: control target
= control target key end

     0   :  { %s1514_s0 = inlined_call_operand.vmem [shape: s32[1,8], index: 0, kind: input, shape index: {}]   ;;  %s1515_s1 = inlined_call_operand.hbm [shape: s32[1,8], index: 1, kind: input, shape index: {}]   ;;  %s1516_s2 = inlined_call_operand.vmem [shape: f32[40,32], index: 2, kind: input, shape index: {}]   ;;  %s1517_s3 = inlined_call_operand.vmem [shape: f32[40,48], index: 3, kind: input, shape index: {}]   ;;  %s1518_s4 = inlined_call_operand.vmem [shape: f32[32,40], index: 4, kind: input, shape index: {}]   ;;  %s1519_s5 = inlined_call_operand.vmem [shape: f32[32,40], index: 5, kind: input, shape index: {}]   ;;  %s1520_s6 = inlined_call_operand.vmem [shape: f32[32,1], index: 6, kind: input, shape index: {}]   ;;  %s1521_s7 = inlined_call_operand.vmem [shape: f32[16,32], index: 7, kind: input, shape index: {}]   ;;  %s1522_s8 = inlined_call_operand.vmem [shape: f32[16,1], index: 8, kind: input, shape index: {}]   ;;  %s1523_s9 = inlined_call_operand.vmem [shape: f32[8,16], index: 9, kind: input, shape index: {}]   ;;  %s1524_s10 = inlined_call_operand.vmem [shape: f32[8,1], index: 10, kind: input, shape index: {}]   ;;  %s1525_s11 = inlined_call_operand.vmem [shape: f32[1,40], index: 11, kind: input, shape index: {}]   ;;  %s1526_s12 = inlined_call_operand.vmem [shape: f32[1,8], index: 12, kind: input, shape index: {}]   ;;  %s1527_s13 = inlined_call_operand.<no memory space> [shape: f32[1,1], index: 13, kind: input, shape index: {}]   ;;  %s1528_s14 = inlined_call_operand.hbm [shape: f32[1,8], index: 14, kind: output, shape index: {}]  }
   0x1   :  { %v19_v0 = vstv %s1527_s13 }
   0x2   :  { %20 = vst [vmem:[#allocation2] sm:$0x1] %v19_v0 }
   0x3   :  { %21 = vsyncpa [#allocation4], 0 }
   0x4   :  { %22 = vsyncpa [#allocation5], 0  ;;  %s1245_s15 = smov [#allocation3]   ;;  %s1197_s19 = scalar_lea.hbm %s1515_s1, 16 }
   0x5   :  { %s31_s16 = sshll.u32 %s1245_s15, 4  ;;  %p1198_p0 = scmp.ne.s32.totalorder %s1515_s1, %s1197_s19  ;;  %s32_s16 = int_to_ptr.vmem [resolvable:$true] %s31_s16 }
   0x6   :  { %p1201_p1 = scmp.lt.u32.totalorder %s1197_s19, %s1515_s1 }
   0x8   :  { %p1203_p2 = pnand %p1201_p1, %p1198_p0 }
   0xa   :  { %1206 = shalt.err (!%p1203_p2)
}
   0xb   :  { %s1207_s13 = scalar_lea.vmem %s32_s16, 16  ;;  %s1211_s24 = scalar_lea.vmem %s32_s16, 32 }
   0xc   :  { %p1208_p3 = scmp.ne.s32.totalorder %s32_s16, %s1207_s13  ;;  %p1212_p4 = scmp.lt.s32.totalorder %s32_s16, %s32_s16 }
   0xd   :  { %p1213_p5 = scmp.lt.s32.totalorder %s1211_s24, %s1207_s13 }
   0xf   :  { %p1214_p6 = por %p1213_p5, %p1212_p4 }
  0x11   :  { %p1215_p7 = pnand %p1214_p6, %p1208_p3 }
  0x13   :  { %1218 = shalt.err (!%p1215_p7)
}
  0x14   :  { %34 = dma.hbm_to_vmem [thread:$0]  %s1515_s1, 16, %s32_s16, [#allocation4]  }
  0x15   :  { %1241 = dma.done.wait [#allocation4], 16  }
  0x16   :  { %1242 = vsyncadd [#allocation4], 4294967280  ;;  %v62_v1 = vlaneseq  ;;  %v1246_v2 = vmov 0.0|0.0   ;;  %vm1247_vm0 = vmmov 0   ;;  %v1248_v4 = vmov 0.0   ;;  %v99_v13 = vld [vmem:[%s1516_s2] sm:$0xff] }
  0x17   :  { %1138 = vmatprep.subr.bf16.mxu1 %v1246_v2  ;;  %1132 = vmatprep.subr.bf16.mxu0 %v1246_v2  ;;  %v924_v8 = vld [vmem:[#allocation3] ss:$0 sm:$0xff]  ;;  %v923_v9 = vld [vmem:[%s1514_s0] ss:$0 sm:$0xff]  ;;  %v1249_v12 = vmov 1.0|1.0  }
  0x18   :  { %v1344_v3 = vshrl.u32 %v62_v1, 7  ;;  %1022 = vmatprep.mubr.msk.f32.mxu0 %vm1247_vm0, %v1248_v4  ;;  %1049 = vmatprep.mubr.msk.f32.mxu1 %vm1247_vm0, %v1248_v4  ;;  %v210_v14 = vld [vmem:[%s1517_s3] sm:$0xff]  ;;  %v100_v15 = vld [vmem:[%s1516_s2 + $0x8] sm:$0xff]  ;;  %v101_v17 = vld [vmem:[%s1516_s2 + $0x10] sm:$0xff]  ;;  %v1250_v25 = vmov 0  }
  0x19   :  { %v211_v16 = vld [vmem:[%s1517_s3 + $0x8] sm:$0xff]  ;;  %v212_v18 = vld [vmem:[%s1517_s3 + $0x10] sm:$0xff]  ;;  %v102_v19 = vld [vmem:[%s1516_s2 + $0x18] sm:$0xff]  ;;  %1191 = vset.pattern.permute.xlu0 %v1250_v25  ;;  %1192 = vset.pattern.permute.xlu1 %v1250_v25 }
  0x1a   :  { %v64_v5 = vadd.s32 8, %v1344_v3  ;;  %v65_v6 = vadd.s32 16, %v1344_v3  ;;  %v66_v7 = vadd.s32 24, %v1344_v3  ;;  %v80_v10 = vadd.s32 32, %v1344_v3  ;;  %v213_v20 = vld [vmem:[%s1517_s3 + $0x18] sm:$0xff]  ;;  %v103_v21 = vld [vmem:[%s1516_s2 + $0x20] sm:$0xff] }
  0x1b   :  { %v81_v11 = vadd.s32 40, %v1344_v3  ;;  %vm87_vm1 = vcmp.eq.s32.totalorder %v1344_v3, %v924_v8  ;;  %vm72_vm3 = vcmp.eq.s32.totalorder %v1344_v3, %v923_v9  ;;  %v214_v22 = vld [vmem:[%s1517_s3 + $0x20] sm:$0xff]  ;;  %v526_v26 = vld [vmem:[%s1520_s6 + $0x10] sm:$0xff]  ;;  %v525_v27 = vld [vmem:[%s1520_s6 + $0x8] sm:$0xff] }
  0x1c   :  { %vm88_vm2 = vcmp.eq.s32.totalorder %v64_v5, %v924_v8  ;;  %vm73_vm4 = vcmp.eq.s32.totalorder %v64_v5, %v923_v9  ;;  %vm89_vm6 = vcmp.eq.s32.totalorder %v65_v6, %v924_v8  ;;  %vm90_vm7 = vcmp.eq.s32.totalorder %v66_v7, %v924_v8  ;;  %v325_v23 = vld [vmem:[%s1519_s5] sm:$0xff]  ;;  %540 = vperm.xlu1 %1192, %v526_v26   ;;  %v527_v28 = vld [vmem:[%s1520_s6 + $0x18] sm:$0xff]  ;;  %v559_v30 = vld [vmem:[%s1522_s8 + $0x8] sm:$0xff] }
  0x1d   :  { %vm1139_vm5 = vmpackc.low %vm88_vm2, %vm87_vm1  ;;  %vm74_vm8 = vcmp.eq.s32.totalorder %v65_v6, %v923_v9  ;;  %vm75_vm9 = vcmp.eq.s32.totalorder %v66_v7, %v923_v9  ;;  %vm91_vm13 = vcmp.eq.s32.totalorder %v80_v10, %v924_v8  ;;  %vm92_vm14 = vcmp.eq.s32.totalorder %v81_v11, %v924_v8  ;;  %v524_v24 = vld [vmem:[%s1520_s6] sm:$0xff]  ;;  %v326_v0 = vld [vmem:[%s1519_s5 + $0x8] sm:$0xff] }
  0x1e   :  { %1140 = vmatpush3.bf16.msk.msra.mxu1 %vm1139_vm5, %v1249_v12  ;;  %vm1133_vm10 = vmpackc.low %vm73_vm4, %vm72_vm3  ;;  %vm104_vm1 = vcmask 261120   ;;  %vm215_vm2 = vcmask 392192   ;;  %vm329_vm3 = vcmask 326656   ;;  %530 = vperm.xlu0 %1191, %v524_v24   ;;  %v558_v29 = vld [vmem:[%s1522_s8] sm:$0xff]  ;;  %v327_v1 = vld [vmem:[%s1519_s5 + $0x10] sm:$0xff]  ;;  %vm660_vm4 = vcmask 130048  }
  0x1f   :  { %1141 = vmatprep.subr.bf16.mxu1 %v1246_v2  ;;  %1134 = vmatpush3.bf16.msk.msra.mxu0 %vm1133_vm10, %v1249_v12  ;;  %vm1142_vm11 = vmpackc.low %vm90_vm7, %vm89_vm6  ;;  %v654_v31 = vld [vmem:[%s1524_s10] sm:$0xff]  ;;  %v328_v5 = vld [vmem:[%s1519_s5 + $0x18] sm:$0xff]  ;;  %vm742_vm5 = vcmask 64512  }
  0x20   :  { %1135 = vmatprep.subr.bf16.mxu0 %v1246_v2  ;;  %vm1136_vm12 = vmpackc.low %vm75_vm9, %vm74_vm8  ;;  %545 = vperm.xlu1 %1192, %v527_v28   ;;  %v889_v32 = vld [vmem:[#allocation2] sm:$0x1]  ;;  %v322_v7 = vld [vmem:[%s1518_s4 + $0x8] sm:$0xff] }
  0x21   :  { %vm1145_vm15 = vmpackc.low %vm92_vm14, %vm91_vm13  ;;  %v321_v6 = vld [vmem:[%s1518_s4] sm:$0xff]  ;;  %v323_v8 = vld [vmem:[%s1518_s4 + $0x10] sm:$0xff] }
  0x22   :  { %1143 = vmatpush3.bf16.msk.msra.mxu1 %vm1142_vm11, %v1249_v12  ;;  %535 = vperm.xlu0 %1191, %v525_v27   ;;  %v324_v9 = vld [vmem:[%s1518_s4 + $0x18] sm:$0xff]  ;;  %v556_v10 = vld [vmem:[%s1521_s7] sm:$0xff] }
  0x23   :  { %1144 = vmatprep.subr.bf16.mxu1 %v1246_v2  ;;  %1137 = vmatpush3.bf16.msk.msra.mxu0 %vm1136_vm12, %v1249_v12 }
  0x24   :  { %567 = vperm.xlu1 %1192, %v559_v30  }
  0x26   :  { %1146 = vmatpush3.bf16.msk.msra.mxu1 %vm1145_vm15, %v1249_v12  ;;  %1023 = vmatmul.mubr.msk.f32.vlgmr.msra.gmra.mrb[0].mxu0 %vm104_vm1, %v99_v13 }
  0x27   :  { %1025 = vmatprep.mubr.msk.f32.mxu0 %vm1247_vm0, %v1248_v4  ;;  %562 = vperm.xlu0 %1191, %v558_v29   ;;  %v557_v29 = vld [vmem:[%s1521_s7 + $0x8] sm:$0xff] }
  0x28   :  { %892 = vperm.xlu1 %1192, %v889_v32  }
  0x29   :  { %1050 = vmatmul.mubr.msk.f32.vlgmr.msra.gmra.mrb[0].mxu1 %vm215_vm2, %v210_v14 }
  0x2a   :  { %1052 = vmatprep.mubr.msk.f32.mxu1 %vm1247_vm0, %v1248_v4  ;;  %1026 = vmatmul.mubr.msk.f32.gmra.mrb[2].mxu0 %vm104_vm1, %v100_v15 }
  0x2b   :  { %1028 = vmatprep.mubr.msk.f32.mxu0 %vm1247_vm0, %v1248_v4  ;;  %657 = vperm.xlu0 %1191, %v654_v31  }
  0x2d   :  { %1053 = vmatmul.mubr.msk.f32.gmra.mrb[2].mxu1 %vm215_vm2, %v211_v16 }
  0x2e   :  { %1055 = vmatprep.mubr.msk.f32.mxu1 %vm1247_vm0, %v1248_v4  ;;  %1029 = vmatmul.mubr.msk.f32.gmra.mrb[4].mxu0 %vm104_vm1, %v101_v17 }
  0x2f   :  { %1031 = vmatprep.mubr.msk.f32.mxu0 %vm1247_vm0, %v1248_v4 }
  0x31   :  { %1056 = vmatmul.mubr.msk.f32.gmra.mrb[4].mxu1 %vm215_vm2, %v212_v18 }
  0x32   :  { %1058 = vmatprep.mubr.msk.f32.mxu1 %vm1247_vm0, %v1248_v4  ;;  %1032 = vmatmul.mubr.msk.f32.gmra.mrb[6].mxu0 %vm104_vm1, %v102_v19 }
  0x33   :  { %1034 = vmatprep.mubr.msk.f32.mxu0 %vm1247_vm0, %v1248_v4 }
  0x35   :  { %1059 = vmatmul.mubr.msk.f32.gmra.mrb[6].mxu1 %vm215_vm2, %v213_v20 }
  0x36   :  { %1061 = vmatprep.mubr.msk.f32.mxu1 %vm1247_vm0, %v1248_v4  ;;  %1035 = vmatmul.mubr.msk.f32.gmra.mrb[8].mxu0 %vm104_vm1, %v103_v21 }
  0x37   :  { %1074 = vmatprep.mubr.msk.f32.mxu0 %vm329_vm3, %v325_v23 }
  0x39   :  { %1062 = vmatmul.mubr.msk.f32.gmra.mrb[8].mxu1 %vm215_vm2, %v214_v22 }
  0x3a   :  { %1104 = vmatprep.mubr.msk.f32.mxu1 %vm104_vm1, %v556_v10 }
  0x9b   :  { %v541_v12 = vpop.permute.xlu1 %540 }
  0x9d   :  { %v531_v11 = vpop.permute.xlu0 %530 }
  0x9f   :  { %v546_v19 = vpop.permute.xlu1 %545 }
  0xa1   :  { %v536_v13 = vpop.permute.xlu0 %535 }
  0xa3   :  { %v568_v30 = vpop.permute.xlu1 %567 }
  0xa6   :  { %v563_v32 = vpop.permute.xlu0 %562 }
  0xf9   :  { %v186_v33 = vpop.f32.mrb[0].mxu0 }
  0xfa   :  { %v1024_v34 = vpop.f32.mrb[1].mxu0 }
  0xfc   :  { %v297_v35 = vpop.f32.mrb[0].mxu1 }
  0xfd   :  { %v736_v36 = vmul.f32 %v297_v35, %v186_v33  ;;  %v1051_v37 = vpop.f32.mrb[1].mxu1  ;;  %v191_v38 = vpop.f32.mrb[2].mxu0 }
  0xfe   :  { %v1155_v39 = vpack.c.bf16 %v191_v38, %v186_v33  ;;  %v1027_v40 = vpop.f32.mrb[3].mxu0 }
  0xff   :  { %v658_v40 = vpop.permute.xlu0 %657 }
 0x100   :  { %v302_v41 = vpop.f32.mrb[2].mxu1 }
 0x101   :  { %v1147_v42 = vpack.c.bf16 %v302_v41, %v297_v35  ;;  %v737_v43 = vmul.f32 %v302_v41, %v191_v38  ;;  %v1054_v44 = vpop.f32.mrb[3].mxu1  ;;  %v196_v45 = vpop.f32.mrb[4].mxu0 }
 0x102   :  { %v1030_v46 = vpop.f32.mrb[5].mxu0 }
 0x103   :  { %v1175_v47 = vpack.c.bf16 %v737_v43, %v736_v36  ;;  %1148 = vmatprep.subr.bf16.mxu0 %v1147_v42 }
 0x104   :  { %v307_v48 = vpop.f32.mrb[4].mxu1  ;;  %1150 = vmatpush3.bf16.msra.mxu0 %v1147_v42 }
 0x105   :  { %v738_v49 = vmul.f32 %v307_v48, %v196_v45  ;;  %v1057_v50 = vpop.f32.mrb[5].mxu1  ;;  %v201_v51 = vpop.f32.mrb[6].mxu0 }
 0x106   :  { %v1159_v52 = vpack.c.bf16 %v201_v51, %v196_v45  ;;  %v1033_v53 = vpop.f32.mrb[7].mxu0  ;;  %v741_v45 = vld [vmem:[%s1526_s12] sm:$0x1] }
 0x108   :  { %v312_v54 = vpop.f32.mrb[6].mxu1 }
 0x109   :  { %v1151_v55 = vpack.c.bf16 %v312_v54, %v307_v48  ;;  %v739_v56 = vmul.f32 %v312_v54, %v201_v51  ;;  %v1060_v57 = vpop.f32.mrb[7].mxu1  ;;  %v206_v58 = vpop.f32.mrb[8].mxu0 }
 0x10a   :  { %v1036_v59 = vpop.f32.mrb[9].mxu0  ;;  %v893_v48 = vpop.permute.xlu1 %892 }
 0x10b   :  { %v1178_v60 = vpack.c.bf16 %v739_v56, %v738_v49  ;;  %1152 = vmatprep.subr.bf16.mxu0 %v1151_v55 }
 0x10c   :  { %1154 = vmatpush3.bf16.msra.mxu0 %v1151_v55  ;;  %v317_v61 = vpop.f32.mrb[8].mxu1 }
 0x10d   :  { %v740_v62 = vmul.f32 %v317_v61, %v206_v58  ;;  %v1063_v63 = vpop.f32.mrb[9].mxu1  ;;  %1072 = vmatprep.subr.mxu0 %v317_v61 }
 0x110   :  { %1073 = vmatpush3.msra.mxu0 %v317_v61 }
 0x111   :  { %1156 = vmatprep.subr.bf16.mxu0 %v1155_v39  ;;  %1075 = vmatmul.mubr.msk.f32.vlgmr.msra.gmra.mrb[10].mxu0 %vm329_vm3, %v326_v0 }
 0x112   :  { %1158 = vmatpush3.bf16.msra.mxu0 %v1155_v39  ;;  %1077 = vmatprep.mubr.msk.f32.mxu0 %vm329_vm3, %v327_v1  ;;  %v653_v39 = vld [vmem:[%s1523_s9] sm:$0xff] }
 0x113   :  { %1160 = vmatprep.subr.bf16.mxu0 %v1159_v52 }
 0x115   :  { %1078 = vmatmul.mubr.msk.f32.gmra.mrb[12].mxu0 %vm329_vm3, %v328_v5 }
 0x116   :  { %1162 = vmatpush3.bf16.msra.mxu0 %v1159_v52  ;;  %1090 = vmatprep.mubr.msk.f32.mxu0 %vm329_vm3, %v321_v6 }
 0x117   :  { %1088 = vmatprep.subr.mxu0 %v206_v58 }
 0x11a   :  { %1089 = vmatpush3.msra.mxu0 %v206_v58 }
 0x11b   :  { %1091 = vmatmul.mubr.msk.f32.vlgmr.msra.gmra.mrb[10].mxu0 %vm329_vm3, %v322_v7  ;;  %1174 = vmatprep.subr.bf16.mxu0 %v1246_v2 }
 0x11c   :  { %1176 = vmatpush3.bf16.msra.mxu0 %v1175_v47  ;;  %1093 = vmatprep.mubr.msk.f32.mxu0 %vm329_vm3, %v323_v8  ;;  %v897_v47 = vsub.s32 0, %v1344_v3 }
 0x11d   :  { %1177 = vmatprep.subr.bf16.mxu0 %v1246_v2 }
 0x11e   :  { %v898_v50 = vrot.slane %v893_v48, %v897_v47 }
 0x11f   :  { %1094 = vmatmul.mubr.msk.f32.gmra.mrb[12].mxu0 %vm329_vm3, %v324_v9 }
 0x120   :  { %1179 = vmatpush3.bf16.msra.mxu0 %v1178_v60  ;;  %1129 = vmatprep.mubr.msk.f32.mxu0 %vm1247_vm0, %v1248_v4 }
 0x121   :  { %1127 = vmatprep.subr.mxu0 %v1248_v4 }
 0x124   :  { %1128 = vmatpush3.msra.mxu0 %v740_v62 }
 0x1ee   :  { %v1092_v14 = vpop.f32.mrb[10].mxu0 }
 0x1ef   :  { %v549_v15 = vadd.f32 %v1092_v14, %v536_v13  ;;  %v505_v16 = vpop.f32.mrb[11].mxu0 }
 0x1f0   :  { %v548_v17 = vadd.f32 %v531_v11, %v505_v16 }
 0x1f1   :  { %v553_v18 = vmax.f32 %v549_v15, 0.0 }
 0x1f2   :  { %v552_v20 = vmax.f32 %v548_v17, 0.0  ;;  %v1095_v21 = vpop.f32.mrb[12].mxu0 }
 0x1f3   :  { %v551_v22 = vadd.f32 %v1095_v21, %v546_v19  ;;  %v515_v23 = vpop.f32.mrb[13].mxu0 }
 0x1f4   :  { %v1163_v24 = vpack.c.bf16 %v553_v18, %v552_v20  ;;  %v550_v25 = vadd.f32 %v541_v12, %v515_v23 }
 0x1f5   :  { %v555_v26 = vmax.f32 %v551_v22, 0.0 }
 0x1f6   :  { %v554_v27 = vmax.f32 %v550_v25, 0.0  ;;  %1164 = vmatprep.subr.bf16.mxu1 %v1163_v24 }
 0x1f7   :  { %1166 = vmatpush3.bf16.msra.mxu1 %v1163_v24 }
 0x1f8   :  { %v1167_v28 = vpack.c.bf16 %v555_v26, %v554_v27 }
 0x1fa   :  { %1168 = vmatprep.subr.bf16.mxu1 %v1167_v28 }
 0x1fb   :  { %1170 = vmatpush3.bf16.msra.mxu1 %v1167_v28 }
 0x1fc   :  { %1171 = vmatprep.subr.bf16.mxu1 %v1246_v2  ;;  %v735_v2 = vld [vmem:[%s1525_s11] sm:$0x1]  ;;  %s1251_s11 = smov [#allocation6]  }
 0x1fd   :  { %1130 = vmatmul.mubr.msk.f32.vlgmr.msra.gmra.mrb[14].mxu0 %vm329_vm3, %v735_v2  ;;  %s914_s12 = sshll.u32 %s1251_s11, 4  ;;  %s915_s12 = int_to_ptr.vmem [resolvable:$true] %s914_s12 }
 0x1fe   :  { %1105 = vmatmul.mubr.msk.f32.vlgmr.msra.gmra.mrb[10].mxu1 %vm104_vm1, %v557_v29  ;;  %s1219_s22 = scalar_lea.vmem %s915_s12, 16  ;;  %s1223_s23 = scalar_lea.vmem %s915_s12, 32 }
 0x1ff   :  { %1111 = vmatprep.mubr.msk.f32.mxu1 %vm1247_vm0, %v1248_v4  ;;  %p1220_p8 = scmp.ne.s32.totalorder %s915_s12, %s1219_s22  ;;  %p1224_p9 = scmp.lt.s32.totalorder %s915_s12, %s915_s12 }
 0x200   :  { %p1225_p10 = scmp.lt.s32.totalorder %s1223_s23, %s1219_s22 }
 0x202   :  { %p1226_p11 = por %p1225_p10, %p1224_p9 }
 0x204   :  { %p1227_p12 = pnand %p1226_p11, %p1220_p8 }
 0x2d0   :  { %v885_v46 = vpop.f32.mrb[14].mxu0 }
 0x2d1   :  { %v1106_v31 = vpop.f32.mrb[10].mxu1 }
 0x2d2   :  { %v648_v33 = vadd.f32 %v1106_v31, %v568_v30  ;;  %v642_v34 = vpop.f32.mrb[11].mxu1 }
 0x2d3   :  { %v643_v35 = vadd.f32 %v642_v34, %v563_v32 }
 0x2d4   :  { %v652_v36 = vmax.f32 %v648_v33, 0.0 }
 0x2d5   :  { %v651_v37 = vmax.f32 %v643_v35, 0.0 }
 0x2d7   :  { %v1172_v38 = vpack.c.bf16 %v652_v36, %v651_v37 }
 0x2d9   :  { %1173 = vmatpush3.bf16.msra.mxu1 %v1172_v38 }
 0x2da   :  { %1114 = vmatprep.subr.mxu1 %v1248_v4 }
 0x2dc   :  { %1112 = vmatmul.mubr.msk.f32.vlgmr.msra.gmra.mrb[12].mxu1 %vm660_vm4, %v653_v39 }
 0x2dd   :  { %1116 = vmatprep.mubr.msk.f32.mxu1 %vm1247_vm0, %v1248_v4  ;;  %v1131_v4 = vpop.f32.mrb[15].mxu0  ;;  %vm906_vm0 = vcmask 57344  }
 0x3af   :  { %v730_v41 = vpop.f32.mrb[12].mxu1 }
 0x3b0   :  { %v731_v42 = vadd.f32 %v730_v41, %v658_v40  ;;  %v1113_v43 = vpop.f32.mrb[13].mxu1 }
 0x3b2   :  { %v734_v44 = vmax.f32 %v731_v42, 0.0 }
 0x3b4   :  { %1115 = vmatpush3.msra.mxu1 %v734_v44 }
 0x3b5   :  { %1117 = vmatmul.mubr.msk.f32.vlgmr.msra.gmra.mrb[14].mxu1 %vm742_vm5, %v741_v45 }
 0x488   :  { %v812_v49 = vpop.f32.mrb[14].mxu1 }
 0x489   :  { %v886_v51 = vadd.f32 %v885_v46, %v812_v49  ;;  %v1118_v52 = vpop.f32.mrb[15].mxu1 }
 0x48b   :  { %v899_v53 = vadd.f32 %v898_v50, %v886_v51 }
 0x48d   :  { %v958_v54 = vmul.f32 -1.442695, %v899_v53 }
 0x48f   :  { %1193 = vpow2.f32 %v958_v54 }
 0x499   :  { %v1194_v55 = vpop.eup %1193 }
 0x49a   :  { %v903_v56 = vadd.f32 1.0, %v1194_v55 }
 0x49c   :  { %1195 = vrcp.f32 %v903_v56 }
 0x4a6   :  { %v1196_v57 = vpop.eup %1195 }
 0x4a7   :  { %907 = vst.msk [vmem:[#allocation6] sm:$0x1] %vm906_vm0, %v1196_v57 }
 0x4a8   :  { %1230 = shalt.err (!%p1227_p12)
}
 0x4a9   :  { %s1231_s6 = scalar_lea.hbm %s1528_s14, 16 }
 0x4aa   :  { %p1232_p13 = scmp.ne.s32.totalorder %s1528_s14, %s1231_s6  ;;  %p1235_p0 = scmp.lt.u32.totalorder %s1231_s6, %s1528_s14 }
 0x4ac   :  { %p1237_p1 = pnand %p1235_p0, %p1232_p13 }
 0x4ae   :  { %1240 = shalt.err (!%p1237_p1)
}
 0x4af   :  { %917 = dma.vmem_to_hbm [thread:$0]  %s915_s12, 16, %s1528_s14, [#allocation5]  }
 0x4b0   :  { %1243 = dma.done.wait [#allocation5], 16  }
 0x4b1   :  { %1244 = vsyncadd [#allocation5], 4294967280 }
 0x4b2   :  { %921 = vsyncpa [#allocation4], 1 }
 0x4b3   :  { %922 = vsyncpa [#allocation5], 1 }

</bundles_post_ra>
